<compile_context>
chip_gen: v7x
topology: tpu7x:2x2x1
jax: 0.10.0
libtpu: 0.0.40
codegen_flags: <defaults>
</compile_context>

<pallas_src>
import functools

import numpy as np

import jax
import jax.numpy as jnp
from jax import lax
from jax.experimental import pallas as pl
from jax.experimental.pallas import tpu as pltpu


def _conv3x3_kernel(x_ref, w_ref, m_ref, o_ref, acc_ref, *, img_w, KH, KW):
    """x_ref:   (C, Q)        unpadded activation, Q = N*H*W (channels on sublanes,
                              flattened batch*spatial on lanes).
       w_ref:   (O, KH*KW*C)  prepared weights, column index = (kh*KW + kw)*C + c.
       m_ref:   (KH*KW, Q)    f32 {0,1} boundary masks per tap (conv halo, row wrap,
                              batch boundaries).
       o_ref:   (O, Q)        output, column q = b*H*W + h*W + w.
       acc_ref: (O, Q) f32    scratch accumulator."""
    C, Q = x_ref.shape
    xv = x_ref[...]
    wv = w_ref[...]
    if xv.dtype != wv.dtype:
        # bf16-weight path: cast the activation in-kernel right before the dot
        # (no wrapper-side astype / extra HBM round trip). Accumulation stays f32.
        xv = xv.astype(wv.dtype)

    acc_ref[...] = jnp.zeros_like(acc_ref)

    for kh in range(KH):
        for kw in range(KW):
            t = kh * KW + kw
            dh = kh - KH // 2
            dw = kw - KW // 2
            s = dh * img_w + dw              # lane shift of this tap
            lo = max(0, -s)                  # output-lane range this tap can touch
            hi = min(Q, Q - s)

            # 128-lane-aligned weight slice (C == 128) -> free.
            w_tap = wv[:, t * C:(t + 1) * C]
            # One MXU dot per tap over the full lane width; f32 accumulation.
            # (v7x can chain these into its MRB; on v5e/v6e the small adds below
            #  touch only a handful of f32 vregs.)
            partial = jnp.dot(w_tap, xv, preferred_element_type=jnp.float32)

            # Shift the (O, Q) partial (NOT the 128-sublane input) and mask out the
            # halo / row-wrap / cross-batch lanes.
            seg = partial[:, lo + s:hi + s]
            if not (dh == 0 and dw == 0):     # center tap is always fully valid
                seg = seg * m_ref[t:t + 1, lo:hi]
            acc_ref[:, lo:hi] += seg

    o_ref[...] = acc_ref[...].astype(o_ref.dtype)


def _tap_masks(N, H, W, KH, KW):
    """(KH*KW, N*H*W) f32 {0,1}: mask[t, q] = 1 iff output position q reads a valid
    (in-bounds, same-image) input sample for tap t. Pure numpy -> trace-time const."""
    q = np.arange(N * H * W)
    h = (q // W) % H
    w = q % W
    rows = []
    for kh in range(KH):
        for kw in range(KW):
            dh, dw = kh - KH // 2, kw - KW // 2
            ok = (h + dh >= 0) & (h + dh < H) & (w + dw >= 0) & (w + dw < W)
            rows.append(ok.astype(np.float32))
    return np.stack(rows, axis=0)


def prepare_conv_weight(w_oihw, dtype=None):
    """OIHW -> (O, KH*KW*C), column index (kh*KW + kw)*C + c. Do this ONCE at
    parameter-load time. dtype=jnp.bfloat16 halves the dominant HBM transfer
    (bf16 matmuls are fine on the v5e/v6e/v7x MXUs)."""
    O, C, KH, KW = w_oihw.shape
    w = jnp.transpose(w_oihw, (0, 2, 3, 1)).reshape(O, KH * KW * C)
    return w.astype(dtype) if dtype is not None else w


@jax.jit
def conv2d_3x3_same(x_nchw, w_prepared):
    """Equivalent of torch.nn.Conv2d(C, O, 3, stride=1, padding=1, bias=False)."""
    N, C, H, W = x_nchw.shape
    O, K = w_prepared.shape
    KH = KW = 3
    assert K == KH * KW * C, (K, C)

    Q = N * H * W
    # (N,C,H,W) -> (C, N*H*W). For N == 1 this is metadata-only (no real transpose).
    x2d = jnp.transpose(x_nchw, (1, 0, 2, 3)).reshape(C, Q)
    masks = jnp.asarray(_tap_masks(N, H, W, KH, KW))       # (9, Q) trace-time constant

    kernel = functools.partial(_conv3x3_kernel, img_w=W, KH=KH, KW=KW)
    out_dtype = x_nchw.dtype
    bytes_accessed = (C * Q * x2d.dtype.itemsize
                      + O * K * w_prepared.dtype.itemsize
                      + masks.size * 4
                      + O * Q * x_nchw.dtype.itemsize)

    out = pl.pallas_call(
        kernel,
        out_shape=jax.ShapeDtypeStruct((O, Q), out_dtype),
        in_specs=[
            pl.BlockSpec(memory_space=pltpu.MemorySpace.VMEM),   # activations
            pl.BlockSpec(memory_space=pltpu.MemorySpace.VMEM),   # weights
            pl.BlockSpec(memory_space=pltpu.MemorySpace.VMEM),   # boundary masks
        ],
        out_specs=pl.BlockSpec(memory_space=pltpu.MemorySpace.VMEM),
        scratch_shapes=[pltpu.VMEM((O, Q), jnp.float32)],        # f32 accumulator
        cost_estimate=pl.CostEstimate(
            flops=2 * O * KH * KW * C * Q,
            bytes_accessed=int(bytes_accessed),
            transcendentals=0),
    )(x2d, w_prepared, masks)

    # (O, N*H*W) -> (N, O, H, W). For N == 1 this is metadata-only.
    return jnp.transpose(out.reshape(O, N, H, W), (1, 0, 2, 3))


if __name__ == "__main__":
    key = jax.random.PRNGKey(0)
    kx, kw_key, kb = jax.random.split(key, 3)

    # Shapes implied by the module's forward: x536 = (1, 128, 7, 7)
    x = jax.random.normal(kx, (1, 128, 7, 7), dtype=jnp.float32)
    # Conv2d(128, 32, kernel_size=3, bias=False) weight: (32, 128, 3, 3)
    w = jax.random.normal(kw_key, (32, 128, 3, 3), dtype=jnp.float32) * 0.05

    # One-time weight prep (done at parameter-load time in a real model).
    w_f32 = prepare_conv_weight(w)                        # exact module semantics
    w_bf16 = prepare_conv_weight(w, dtype=jnp.bfloat16)   # halved weight HBM traffic

    # Reference (same NCHW/OIHW convention as PyTorch).
    y_ref = lax.conv_general_dilated(
        x, w, window_strides=(1, 1), padding=((1, 1), (1, 1)),
        dimension_numbers=("NCHW", "OIHW", "NCHW"))

    # f32 path (module-exact).
    y = conv2d_3x3_same(x, w_f32)
    jax.block_until_ready(y)
    assert y.shape == (1, 32, 7, 7), y.shape
    assert jnp.allclose(y, y_ref, atol=2e-3, rtol=2e-3), "f32 mismatch vs reference conv"

    # bf16-weight path (activation cast happens inside the kernel; f32 accumulation).
    y_bf16 = conv2d_3x3_same(x, w_bf16)
    jax.block_until_ready(y_bf16)
    assert jnp.allclose(y_bf16, y_ref, atol=1e-1, rtol=5e-2), "bf16 mismatch vs reference conv"

    # Batched path: batch packed along the MXU N / lane dimension (also exercises
    # the cross-batch boundary masking).
    xb = jax.random.normal(kb, (2, 128, 7, 7), dtype=jnp.float32)
    yb = conv2d_3x3_same(xb, w_f32)
    jax.block_until_ready(yb)
    yb_ref = lax.conv_general_dilated(
        xb, w, window_strides=(1, 1), padding=((1, 1), (1, 1)),
        dimension_numbers=("NCHW", "OIHW", "NCHW"))
    assert yb.shape == (2, 32, 7, 7), yb.shape
    assert jnp.allclose(yb, yb_ref, atol=2e-3, rtol=2e-3), "batched mismatch vs reference conv"

    print("KERNEL_OK")
</pallas_src>

<mosaic_0001>
module attributes {stable_mosaic.version = 11 : i64} {
  func.func @_conv3x3_kernel(%arg0: memref<128x49xf32, #tpu.memory_space<vmem>>, %arg1: memref<32x1152xf32, #tpu.memory_space<vmem>>, %arg2: memref<9x49xf32, #tpu.memory_space<vmem>>, %arg3: memref<32x49xf32, #tpu.memory_space<vmem>>, %arg4: memref<32x49xf32, #tpu.memory_space<vmem>>) attributes {dimension_semantics = [], scalar_prefetch = 0 : i64, scratch_operands = 1 : i64, tpu.core_type = #tpu.core_type<tc>} {
    %c0 = arith.constant 0 : index
    %c0_0 = arith.constant 0 : index
    %0 = vector.load %arg0[%c0, %c0_0] : memref<128x49xf32, #tpu.memory_space<vmem>>, vector<128x49xf32>
    %c0_1 = arith.constant 0 : index
    %c0_2 = arith.constant 0 : index
    %1 = vector.load %arg1[%c0_1, %c0_2] : memref<32x1152xf32, #tpu.memory_space<vmem>>, vector<32x1152xf32>
    %cst = arith.constant 0.000000e+00 : f32
    %2 = vector.broadcast %cst : f32 to vector<32x49xf32>
    %c0_3 = arith.constant 0 : index
    %c0_4 = arith.constant 0 : index
    %3 = vector.load %arg4[%c0_3, %c0_4] : memref<32x49xf32, #tpu.memory_space<vmem>>, vector<32x49xf32>
    tpu.vector_store %arg4[%c0_3, %c0_4], %2 {strides = array<i32>} : memref<32x49xf32, #tpu.memory_space<vmem>>, vector<32x49xf32>,
    %4 = vector.extract_strided_slice %1 {offsets = [0, 0], sizes = [32, 128], strides = [1, 1]} : vector<32x1152xf32> to vector<32x128xf32>
    %cst_5 = arith.constant dense<0.000000e+00> : vector<32x49xf32>
    %5 = tpu.matmul %4, %0, %cst_5 {dimension_numbers = #tpu.dot_dimension_numbers<[1], [0], [0], [1], [0, 0, 1, 1], [], []>} : vector<32x128xf32>, vector<128x49xf32>, vector<32x49xf32> -> vector<32x49xf32>
    %6 = vector.extract_strided_slice %5 {offsets = [0, 0], sizes = [32, 41], strides = [1, 1]} : vector<32x49xf32> to vector<32x41xf32>
    %c0_6 = arith.constant 0 : index
    %c8 = arith.constant 8 : index
    %7 = vector.load %arg2[%c0_6, %c8] : memref<9x49xf32, #tpu.memory_space<vmem>>, vector<1x41xf32>
    %8 = vector.broadcast %7 : vector<1x41xf32> to vector<32x41xf32>
    %9 = arith.mulf %6, %8 : vector<32x41xf32>
    %c0_7 = arith.constant 0 : index
    %c8_8 = arith.constant 8 : index
    %10 = vector.load %arg4[%c0_7, %c8_8] : memref<32x49xf32, #tpu.memory_space<vmem>>, vector<32x41xf32>
    %11 = arith.addf %10, %9 : vector<32x41xf32>
    %c0_9 = arith.constant 0 : index
    %c8_10 = arith.constant 8 : index
    %12 = vector.load %arg4[%c0_9, %c8_10] : memref<32x49xf32, #tpu.memory_space<vmem>>, vector<32x41xf32>
    tpu.vector_store %arg4[%c0_9, %c8_10], %11 {strides = array<i32>} : memref<32x49xf32, #tpu.memory_space<vmem>>, vector<32x41xf32>,
    %13 = vector.extract_strided_slice %1 {offsets = [0, 128], sizes = [32, 128], strides = [1, 1]} : vector<32x1152xf32> to vector<32x128xf32>
    %cst_11 = arith.constant dense<0.000000e+00> : vector<32x49xf32>
    %14 = tpu.matmul %13, %0, %cst_11 {dimension_numbers = #tpu.dot_dimension_numbers<[1], [0], [0], [1], [0, 0, 1, 1], [], []>} : vector<32x128xf32>, vector<128x49xf32>, vector<32x49xf32> -> vector<32x49xf32>
    %15 = vector.extract_strided_slice %14 {offsets = [0, 0], sizes = [32, 42], strides = [1, 1]} : vector<32x49xf32> to vector<32x42xf32>
    %c1 = arith.constant 1 : index
    %c7 = arith.constant 7 : index
    %16 = vector.load %arg2[%c1, %c7] : memref<9x49xf32, #tpu.memory_space<vmem>>, vector<1x42xf32>
    %17 = vector.broadcast %16 : vector<1x42xf32> to vector<32x42xf32>
    %18 = arith.mulf %15, %17 : vector<32x42xf32>
    %c0_12 = arith.constant 0 : index
    %c7_13 = arith.constant 7 : index
    %19 = vector.load %arg4[%c0_12, %c7_13] : memref<32x49xf32, #tpu.memory_space<vmem>>, vector<32x42xf32>
    %20 = arith.addf %19, %18 : vector<32x42xf32>
    %c0_14 = arith.constant 0 : index
    %c7_15 = arith.constant 7 : index
    %21 = vector.load %arg4[%c0_14, %c7_15] : memref<32x49xf32, #tpu.memory_space<vmem>>, vector<32x42xf32>
    tpu.vector_store %arg4[%c0_14, %c7_15], %20 {strides = array<i32>} : memref<32x49xf32, #tpu.memory_space<vmem>>, vector<32x42xf32>,
    %22 = vector.extract_strided_slice %1 {offsets = [0, 256], sizes = [32, 128], strides = [1, 1]} : vector<32x1152xf32> to vector<32x128xf32>
    %cst_16 = arith.constant dense<0.000000e+00> : vector<32x49xf32>
    %23 = tpu.matmul %22, %0, %cst_16 {dimension_numbers = #tpu.dot_dimension_numbers<[1], [0], [0], [1], [0, 0, 1, 1], [], []>} : vector<32x128xf32>, vector<128x49xf32>, vector<32x49xf32> -> vector<32x49xf32>
    %24 = vector.extract_strided_slice %23 {offsets = [0, 0], sizes = [32, 43], strides = [1, 1]} : vector<32x49xf32> to vector<32x43xf32>
    %c2 = arith.constant 2 : index
    %c6 = arith.constant 6 : index
    %25 = vector.load %arg2[%c2, %c6] : memref<9x49xf32, #tpu.memory_space<vmem>>, vector<1x43xf32>
    %26 = vector.broadcast %25 : vector<1x43xf32> to vector<32x43xf32>
    %27 = arith.mulf %24, %26 : vector<32x43xf32>
    %c0_17 = arith.constant 0 : index
    %c6_18 = arith.constant 6 : index
    %28 = vector.load %arg4[%c0_17, %c6_18] : memref<32x49xf32, #tpu.memory_space<vmem>>, vector<32x43xf32>
    %29 = arith.addf %28, %27 : vector<32x43xf32>
    %c0_19 = arith.constant 0 : index
    %c6_20 = arith.constant 6 : index
    %30 = vector.load %arg4[%c0_19, %c6_20] : memref<32x49xf32, #tpu.memory_space<vmem>>, vector<32x43xf32>
    tpu.vector_store %arg4[%c0_19, %c6_20], %29 {strides = array<i32>} : memref<32x49xf32, #tpu.memory_space<vmem>>, vector<32x43xf32>,
    %31 = vector.extract_strided_slice %1 {offsets = [0, 384], sizes = [32, 128], strides = [1, 1]} : vector<32x1152xf32> to vector<32x128xf32>
    %cst_21 = arith.constant dense<0.000000e+00> : vector<32x49xf32>
    %32 = tpu.matmul %31, %0, %cst_21 {dimension_numbers = #tpu.dot_dimension_numbers<[1], [0], [0], [1], [0, 0, 1, 1], [], []>} : vector<32x128xf32>, vector<128x49xf32>, vector<32x49xf32> -> vector<32x49xf32>
    %33 = vector.extract_strided_slice %32 {offsets = [0, 0], sizes = [32, 48], strides = [1, 1]} : vector<32x49xf32> to vector<32x48xf32>
    %c3 = arith.constant 3 : index
    %c1_22 = arith.constant 1 : index
    %34 = vector.load %arg2[%c3, %c1_22] : memref<9x49xf32, #tpu.memory_space<vmem>>, vector<1x48xf32>
    %35 = vector.broadcast %34 : vector<1x48xf32> to vector<32x48xf32>
    %36 = arith.mulf %33, %35 : vector<32x48xf32>
    %c0_23 = arith.constant 0 : index
    %c1_24 = arith.constant 1 : index
    %37 = vector.load %arg4[%c0_23, %c1_24] : memref<32x49xf32, #tpu.memory_space<vmem>>, vector<32x48xf32>
    %38 = arith.addf %37, %36 : vector<32x48xf32>
    %c0_25 = arith.constant 0 : index
    %c1_26 = arith.constant 1 : index
    %39 = vector.load %arg4[%c0_25, %c1_26] : memref<32x49xf32, #tpu.memory_space<vmem>>, vector<32x48xf32>
    tpu.vector_store %arg4[%c0_25, %c1_26], %38 {strides = array<i32>} : memref<32x49xf32, #tpu.memory_space<vmem>>, vector<32x48xf32>,
    %40 = vector.extract_strided_slice %1 {offsets = [0, 512], sizes = [32, 128], strides = [1, 1]} : vector<32x1152xf32> to vector<32x128xf32>
    %cst_27 = arith.constant dense<0.000000e+00> : vector<32x49xf32>
    %41 = tpu.matmul %40, %0, %cst_27 {dimension_numbers = #tpu.dot_dimension_numbers<[1], [0], [0], [1], [0, 0, 1, 1], [], []>} : vector<32x128xf32>, vector<128x49xf32>, vector<32x49xf32> -> vector<32x49xf32>
    %c0_28 = arith.constant 0 : index
    %c0_29 = arith.constant 0 : index
    %42 = vector.load %arg4[%c0_28, %c0_29] : memref<32x49xf32, #tpu.memory_space<vmem>>, vector<32x49xf32>
    %43 = arith.addf %42, %41 : vector<32x49xf32>
    %c0_30 = arith.constant 0 : index
    %c0_31 = arith.constant 0 : index
    %44 = vector.load %arg4[%c0_30, %c0_31] : memref<32x49xf32, #tpu.memory_space<vmem>>, vector<32x49xf32>
    tpu.vector_store %arg4[%c0_30, %c0_31], %43 {strides = array<i32>} : memref<32x49xf32, #tpu.memory_space<vmem>>, vector<32x49xf32>,
    %45 = vector.extract_strided_slice %1 {offsets = [0, 640], sizes = [32, 128], strides = [1, 1]} : vector<32x1152xf32> to vector<32x128xf32>
    %cst_32 = arith.constant dense<0.000000e+00> : vector<32x49xf32>
    %46 = tpu.matmul %45, %0, %cst_32 {dimension_numbers = #tpu.dot_dimension_numbers<[1], [0], [0], [1], [0, 0, 1, 1], [], []>} : vector<32x128xf32>, vector<128x49xf32>, vector<32x49xf32> -> vector<32x49xf32>
    %47 = vector.extract_strided_slice %46 {offsets = [0, 1], sizes = [32, 48], strides = [1, 1]} : vector<32x49xf32> to vector<32x48xf32>
    %c5 = arith.constant 5 : index
    %c0_33 = arith.constant 0 : index
    %48 = vector.load %arg2[%c5, %c0_33] : memref<9x49xf32, #tpu.memory_space<vmem>>, vector<1x48xf32>
    %49 = vector.broadcast %48 : vector<1x48xf32> to vector<32x48xf32>
    %50 = arith.mulf %47, %49 : vector<32x48xf32>
    %c0_34 = arith.constant 0 : index
    %c0_35 = arith.constant 0 : index
    %51 = vector.load %arg4[%c0_34, %c0_35] : memref<32x49xf32, #tpu.memory_space<vmem>>, vector<32x48xf32>
    %52 = arith.addf %51, %50 : vector<32x48xf32>
    %c0_36 = arith.constant 0 : index
    %c0_37 = arith.constant 0 : index
    %53 = vector.load %arg4[%c0_36, %c0_37] : memref<32x49xf32, #tpu.memory_space<vmem>>, vector<32x48xf32>
    tpu.vector_store %arg4[%c0_36, %c0_37], %52 {strides = array<i32>} : memref<32x49xf32, #tpu.memory_space<vmem>>, vector<32x48xf32>,
    %54 = vector.extract_strided_slice %1 {offsets = [0, 768], sizes = [32, 128], strides = [1, 1]} : vector<32x1152xf32> to vector<32x128xf32>
    %cst_38 = arith.constant dense<0.000000e+00> : vector<32x49xf32>
    %55 = tpu.matmul %54, %0, %cst_38 {dimension_numbers = #tpu.dot_dimension_numbers<[1], [0], [0], [1], [0, 0, 1, 1], [], []>} : vector<32x128xf32>, vector<128x49xf32>, vector<32x49xf32> -> vector<32x49xf32>
    %56 = vector.extract_strided_slice %55 {offsets = [0, 6], sizes = [32, 43], strides = [1, 1]} : vector<32x49xf32> to vector<32x43xf32>
    %c6_39 = arith.constant 6 : index
    %c0_40 = arith.constant 0 : index
    %57 = vector.load %arg2[%c6_39, %c0_40] : memref<9x49xf32, #tpu.memory_space<vmem>>, vector<1x43xf32>
    %58 = vector.broadcast %57 : vector<1x43xf32> to vector<32x43xf32>
    %59 = arith.mulf %56, %58 : vector<32x43xf32>
    %c0_41 = arith.constant 0 : index
    %c0_42 = arith.constant 0 : index
    %60 = vector.load %arg4[%c0_41, %c0_42] : memref<32x49xf32, #tpu.memory_space<vmem>>, vector<32x43xf32>
    %61 = arith.addf %60, %59 : vector<32x43xf32>
    %c0_43 = arith.constant 0 : index
    %c0_44 = arith.constant 0 : index
    %62 = vector.load %arg4[%c0_43, %c0_44] : memref<32x49xf32, #tpu.memory_space<vmem>>, vector<32x43xf32>
    tpu.vector_store %arg4[%c0_43, %c0_44], %61 {strides = array<i32>} : memref<32x49xf32, #tpu.memory_space<vmem>>, vector<32x43xf32>,
    %63 = vector.extract_strided_slice %1 {offsets = [0, 896], sizes = [32, 128], strides = [1, 1]} : vector<32x1152xf32> to vector<32x128xf32>
    %cst_45 = arith.constant dense<0.000000e+00> : vector<32x49xf32>
    %64 = tpu.matmul %63, %0, %cst_45 {dimension_numbers = #tpu.dot_dimension_numbers<[1], [0], [0], [1], [0, 0, 1, 1], [], []>} : vector<32x128xf32>, vector<128x49xf32>, vector<32x49xf32> -> vector<32x49xf32>
    %65 = vector.extract_strided_slice %64 {offsets = [0, 7], sizes = [32, 42], strides = [1, 1]} : vector<32x49xf32> to vector<32x42xf32>
    %c7_46 = arith.constant 7 : index
    %c0_47 = arith.constant 0 : index
    %66 = vector.load %arg2[%c7_46, %c0_47] : memref<9x49xf32, #tpu.memory_space<vmem>>, vector<1x42xf32>
    %67 = vector.broadcast %66 : vector<1x42xf32> to vector<32x42xf32>
    %68 = arith.mulf %65, %67 : vector<32x42xf32>
    %c0_48 = arith.constant 0 : index
    %c0_49 = arith.constant 0 : index
    %69 = vector.load %arg4[%c0_48, %c0_49] : memref<32x49xf32, #tpu.memory_space<vmem>>, vector<32x42xf32>
    %70 = arith.addf %69, %68 : vector<32x42xf32>
    %c0_50 = arith.constant 0 : index
    %c0_51 = arith.constant 0 : index
    %71 = vector.load %arg4[%c0_50, %c0_51] : memref<32x49xf32, #tpu.memory_space<vmem>>, vector<32x42xf32>
    tpu.vector_store %arg4[%c0_50, %c0_51], %70 {strides = array<i32>} : memref<32x49xf32, #tpu.memory_space<vmem>>, vector<32x42xf32>,
    %72 = vector.extract_strided_slice %1 {offsets = [0, 1024], sizes = [32, 128], strides = [1, 1]} : vector<32x1152xf32> to vector<32x128xf32>
    %cst_52 = arith.constant dense<0.000000e+00> : vector<32x49xf32>
    %73 = tpu.matmul %72, %0, %cst_52 {dimension_numbers = #tpu.dot_dimension_numbers<[1], [0], [0], [1], [0, 0, 1, 1], [], []>} : vector<32x128xf32>, vector<128x49xf32>, vector<32x49xf32> -> vector<32x49xf32>
    %74 = vector.extract_strided_slice %73 {offsets = [0, 8], sizes = [32, 41], strides = [1, 1]} : vector<32x49xf32> to vector<32x41xf32>
    %c8_53 = arith.constant 8 : index
    %c0_54 = arith.constant 0 : index
    %75 = vector.load %arg2[%c8_53, %c0_54] : memref<9x49xf32, #tpu.memory_space<vmem>>, vector<1x41xf32>
    %76 = vector.broadcast %75 : vector<1x41xf32> to vector<32x41xf32>
    %77 = arith.mulf %74, %76 : vector<32x41xf32>
    %c0_55 = arith.constant 0 : index
    %c0_56 = arith.constant 0 : index
    %78 = vector.load %arg4[%c0_55, %c0_56] : memref<32x49xf32, #tpu.memory_space<vmem>>, vector<32x41xf32>
    %79 = arith.addf %78, %77 : vector<32x41xf32>
    %c0_57 = arith.constant 0 : index
    %c0_58 = arith.constant 0 : index
    %80 = vector.load %arg4[%c0_57, %c0_58] : memref<32x49xf32, #tpu.memory_space<vmem>>, vector<32x41xf32>
    tpu.vector_store %arg4[%c0_57, %c0_58], %79 {strides = array<i32>} : memref<32x49xf32, #tpu.memory_space<vmem>>, vector<32x41xf32>,
    %c0_59 = arith.constant 0 : index
    %c0_60 = arith.constant 0 : index
    %81 = vector.load %arg4[%c0_59, %c0_60] : memref<32x49xf32, #tpu.memory_space<vmem>>, vector<32x49xf32>
    %c0_61 = arith.constant 0 : index
    %c0_62 = arith.constant 0 : index
    %82 = vector.load %arg3[%c0_61, %c0_62] : memref<32x49xf32, #tpu.memory_space<vmem>>, vector<32x49xf32>
    tpu.vector_store %arg3[%c0_61, %c0_62], %81 {strides = array<i32>} : memref<32x49xf32, #tpu.memory_space<vmem>>, vector<32x49xf32>,
    return
  }
}

</mosaic_0001>

<bundles_post_ra>
// kernel: conv2d_3x3_same.1
= control target key start
LH: loop header
LB: loop body
LE: loop exit
PB: predicated region body
PF: predicated region fallthrough
CT: control target
= control target key end

     0   :  { %s2039_s15 = smov 120   ;;  %s2040_s24 = smov 122   ;;  %vm66_vm0 = vcmask 400384   ;;  %vm193_vm1 = vcmask 400448   ;;  %vm320_vm2 = vcmask 400440   ;;  %vm447_vm3 = vcmask 400432   ;;  %s2511_s0 = inlined_call_operand.vmem [shape: f32[128,49], index: 0, kind: input, shape index: {}]   ;;  %s2512_s1 = inlined_call_operand.vmem [shape: f32[32,1152], index: 1, kind: input, shape index: {}]   ;;  %s2513_s2 = inlined_call_operand.vmem [shape: f32[9,49], index: 2, kind: input, shape index: {}]   ;;  %s2514_s3 = inlined_call_operand.vmem [shape: f32[32,49], index: 3, kind: output, shape index: {}]  }
   0x1   :  { %v14_v0 = vld [vmem:[%s2511_s0] sm:$0xff]  ;;  %v15_v1 = vld [vmem:[%s2511_s0 + $0x8] sm:$0xff]  ;;  %v16_v2 = vld [vmem:[%s2511_s0 + $0x10] sm:$0xff]  ;;  %s2041_s25 = smov 121   ;;  %s2042_s5 = smov 127   ;;  %vm574_vm4 = vcmask 400392  }
   0x2   :  { %v2077_v3 = vpack.c.bf16 %v15_v1, %v14_v0  ;;  %v17_v4 = vld [vmem:[%s2511_s0 + $0x18] sm:$0xff]  ;;  %v18_v6 = vld [vmem:[%s2511_s0 + $0x20] sm:$0xff]  ;;  %v19_v7 = vld [vmem:[%s2511_s0 + $0x28] sm:$0xff]  ;;  %s2043_s28 = smov 1   ;;  %s2044_s29 = smov 6   ;;  %vm798_vm5 = vcmask 392192  }
   0x3   :  { %v2082_v5 = vpack.c.bf16 %v17_v4, %v16_v2  ;;  %v2096_v8 = vpack.c.bf16 %v19_v7, %v18_v6  ;;  %v30_v9 = vld [vmem:[%s2512_s1] sm:$0xff]  ;;  %v20_v10 = vld [vmem:[%s2511_s0 + $0x30] sm:$0xff]  ;;  %v21_v11 = vld [vmem:[%s2511_s0 + $0x38] sm:$0xff]  ;;  %v2045_v2 = vmov 0.0   ;;  %s2047_s11 = smov 7   ;;  %vm925_vm6 = vcmask 351232  }
   0x4   :  { %1727 = vmatprep.subr.bf16.mxu0 %v2077_v3  ;;  %1759 = vmatprep.subr.bf16.mxu1 %v2077_v3  ;;  %v31_v12 = vld [vmem:[%s2512_s1 + $0x8] sm:$0xff]  ;;  %v2114_v13 = vpack.c.bf16 %v21_v11, %v20_v10  ;;  %v22_v14 = vld [vmem:[%s2511_s0 + $0x40] sm:$0xff]  ;;  %v24_v17 = vld [vmem:[%s2511_s0 + $0x50] sm:$0xff]  ;;  %68 = vst.msk [vmem:[#allocation2 + $0x8] sm:$0xff] %vm66_vm0, %v2045_v2  ;;  %vm1052_vm7 = vcmask 343040   ;;  %vm1179_vm8 = vcmask 334848  }
   0x5   :  { %1729 = vmatpush3.bf16.msra.mxu0 %v2077_v3  ;;  %1761 = vmatpush3.bf16.msra.mxu1 %v2077_v3  ;;  %v23_v15 = vld [vmem:[%s2511_s0 + $0x48] sm:$0xff]  ;;  %v25_v18 = vld [vmem:[%s2511_s0 + $0x58] sm:$0xff]  ;;  %v1196_v19 = vld [vmem:[%s2513_s2] ss:$0 sm:$0xff]  ;;  %67 = vst.msk [vmem:[#allocation2] sm:$0xff] %vm66_vm0, %v2045_v2 }
   0x6   :  { %1731 = vmatprep.subr.bf16.mxu0 %v2082_v5  ;;  %1763 = vmatprep.subr.bf16.mxu1 %v2082_v5  ;;  %v2126_v16 = vpack.c.bf16 %v23_v15, %v22_v14  ;;  %v1197_v20 = vld [vmem:[%s2513_s2 + $0x1] ss:$0 sm:$0xff]  ;;  %v1198_v21 = vld [vmem:[%s2513_s2 + $0x2] ss:$0 sm:$0xff]  ;;  %v2148_v22 = vpack.c.bf16 %v25_v18, %v24_v17  ;;  %v27_v24 = vld [vmem:[%s2511_s0 + $0x68] sm:$0xff]  ;;  %69 = vst.msk [vmem:[#allocation2 + $0x10] sm:$0xff] %vm66_vm0, %v2045_v2 }
   0x7   :  { %1416 = vmatprep.mubr.f32.mxu0 %v30_v9  ;;  %1454 = vmatprep.mubr.f32.mxu1 %v31_v12  ;;  %v26_v23 = vld [vmem:[%s2511_s0 + $0x60] sm:$0xff]  ;;  %v28_v27 = vld [vmem:[%s2511_s0 + $0x70] sm:$0xff]  ;;  %v29_v28 = vld [vmem:[%s2511_s0 + $0x78] sm:$0xff]  ;;  %70 = vst.msk [vmem:[#allocation2 + $0x18] sm:$0xff] %vm66_vm0, %v2045_v2 }
   0x8   :  { %162 = vrot.lane.b32.xlu0 %v1196_v19, %s2039_s15  ;;  %416 = vrot.lane.b32.xlu1 %v1198_v21, %s2040_s24  ;;  %v1199_v25 = vld [vmem:[%s2513_s2 + $0x3] ss:$0 sm:$0xff]  ;;  %v2165_v26 = vpack.c.bf16 %v27_v24, %v26_v23  ;;  %v2178_v29 = vpack.c.bf16 %v29_v28, %v28_v27  ;;  %v39_v30 = vld [vmem:[%s2512_s1 + $0x48] sm:$0xff] }
   0x9   :  { %1733 = vmatpush3.bf16.msra.mxu0 %v2082_v5  ;;  %1765 = vmatpush3.bf16.msra.mxu1 %v2082_v5  ;;  %v40_v31 = vld [vmem:[%s2512_s1 + $0x50] sm:$0xff]  ;;  %v49_v33 = vld [vmem:[%s2512_s1 + $0x98] sm:$0xff]  ;;  %v58_v35 = vld [vmem:[%s2512_s1 + $0xe0] sm:$0xff] }
   0xa   :  { %1735 = vmatprep.subr.bf16.mxu0 %v2096_v8  ;;  %1767 = vmatprep.subr.bf16.mxu1 %v2096_v8  ;;  %v48_v32 = vld [vmem:[%s2512_s1 + $0x90] sm:$0xff]  ;;  %v57_v34 = vld [vmem:[%s2512_s1 + $0xd8] sm:$0xff]  ;;  %v1200_v38 = vld [vmem:[%s2513_s2 + $0x5] ss:$0 sm:$0xff] }
   0xb   :  { %v32_v36 = vld [vmem:[%s2512_s1 + $0x10] sm:$0xff]  ;;  %v33_v37 = vld [vmem:[%s2512_s1 + $0x18] sm:$0xff]  ;;  %v1201_v39 = vld [vmem:[%s2513_s2 + $0x6] ss:$0 sm:$0xff] }
   0xc   :  { %289 = vrot.lane.b32.xlu0 %v1197_v20, %s2041_s25  ;;  %543 = vrot.lane.b32.xlu1 %v1199_v25, %s2042_s5  ;;  %v41_v40 = vld [vmem:[%s2512_s1 + $0x58] sm:$0xff]  ;;  %v42_v41 = vld [vmem:[%s2512_s1 + $0x60] sm:$0xff] }
   0xd   :  { %1737 = vmatpush3.bf16.msra.mxu0 %v2096_v8  ;;  %1769 = vmatpush3.bf16.msra.mxu1 %v2096_v8  ;;  %v50_v42 = vld [vmem:[%s2512_s1 + $0xa0] sm:$0xff]  ;;  %v51_v43 = vld [vmem:[%s2512_s1 + $0xa8] sm:$0xff]  ;;  %v60_v45 = vld [vmem:[%s2512_s1 + $0xf0] sm:$0xff] }
   0xe   :  { %1739 = vmatprep.subr.bf16.mxu0 %v2114_v13  ;;  %1771 = vmatprep.subr.bf16.mxu1 %v2114_v13  ;;  %v59_v44 = vld [vmem:[%s2512_s1 + $0xe8] sm:$0xff]  ;;  %v34_v47 = vld [vmem:[%s2512_s1 + $0x20] sm:$0xff]  ;;  %v44_v48 = vld [vmem:[%s2512_s1 + $0x70] sm:$0xff] }
   0xf   :  { %v35_v46 = vld [vmem:[%s2512_s1 + $0x28] sm:$0xff]  ;;  %v53_v50 = vld [vmem:[%s2512_s1 + $0xb8] sm:$0xff]  ;;  %v52_v51 = vld [vmem:[%s2512_s1 + $0xb0] sm:$0xff] }
  0x10   :  { %767 = vrot.lane.b32.xlu0 %v1200_v38, %s2043_s28  ;;  %894 = vrot.lane.b32.xlu1 %v1201_v39, %s2044_s29  ;;  %v43_v49 = vld [vmem:[%s2512_s1 + $0x68] sm:$0xff]  ;;  %v62_v52 = vld [vmem:[%s2512_s1 + $0x100] sm:$0xff] }
  0x11   :  { %1741 = vmatpush3.bf16.msra.mxu0 %v2114_v13  ;;  %1773 = vmatpush3.bf16.msra.mxu1 %v2114_v13  ;;  %v61_v53 = vld [vmem:[%s2512_s1 + $0xf8] sm:$0xff]  ;;  %v36_v54 = vld [vmem:[%s2512_s1 + $0x30] sm:$0xff]  ;;  %v54_v57 = vld [vmem:[%s2512_s1 + $0xc0] sm:$0xff] }
  0x12   :  { %1743 = vmatprep.subr.bf16.mxu0 %v2126_v16  ;;  %1775 = vmatprep.subr.bf16.mxu1 %v2126_v16  ;;  %v37_v55 = vld [vmem:[%s2512_s1 + $0x38] sm:$0xff]  ;;  %v46_v58 = vld [vmem:[%s2512_s1 + $0x80] sm:$0xff]  ;;  %v55_v59 = vld [vmem:[%s2512_s1 + $0xc8] sm:$0xff] }
  0x13   :  { %v45_v56 = vld [vmem:[%s2512_s1 + $0x78] sm:$0xff]  ;;  %v63_v60 = vld [vmem:[%s2512_s1 + $0x108] sm:$0xff]  ;;  %v38_v61 = vld [vmem:[%s2512_s1 + $0x40] sm:$0xff] }
  0x14   :  { %v64_v62 = vld [vmem:[%s2512_s1 + $0x110] sm:$0xff]  ;;  %v47_v0 = vld [vmem:[%s2512_s1 + $0x88] sm:$0xff]  ;;  %v65_v1 = vld [vmem:[%s2512_s1 + $0x118] sm:$0xff] }
  0x15   :  { %1745 = vmatpush3.bf16.msra.mxu0 %v2126_v16  ;;  %1777 = vmatpush3.bf16.msra.mxu1 %v2126_v16  ;;  %v56_v63 = vld [vmem:[%s2512_s1 + $0xd0] sm:$0xff]  ;;  %s2046_s1 = smov 8   ;;  %v1202_v21 = vld [vmem:[%s2513_s2 + $0x7] ss:$0 sm:$0xff] }
  0x16   :  { %1747 = vmatprep.subr.bf16.mxu0 %v2148_v22  ;;  %1779 = vmatprep.subr.bf16.mxu1 %v2148_v22 }
  0x19   :  { %1749 = vmatpush3.bf16.msra.mxu0 %v2148_v22  ;;  %1781 = vmatpush3.bf16.msra.mxu1 %v2148_v22 }
  0x1a   :  { %1751 = vmatprep.subr.bf16.mxu0 %v2165_v26  ;;  %1783 = vmatprep.subr.bf16.mxu1 %v2165_v26 }
  0x1d   :  { %1753 = vmatpush3.bf16.msra.mxu0 %v2165_v26  ;;  %1785 = vmatpush3.bf16.msra.mxu1 %v2165_v26 }
  0x1e   :  { %1755 = vmatprep.subr.bf16.mxu0 %v2178_v29  ;;  %1787 = vmatprep.subr.bf16.mxu1 %v2178_v29 }
  0x21   :  { %1757 = vmatpush3.bf16.msra.mxu0 %v2178_v29  ;;  %1789 = vmatpush3.bf16.msra.mxu1 %v2178_v29 }
  0x22   :  { %1791 = vmatprep.subr.bf16.mxu0 %v2077_v3  ;;  %1823 = vmatprep.subr.bf16.mxu1 %v2077_v3 }
  0x24   :  { %1417 = vmatmul.mubr.f32.vlgmr.msra.gmra.mrb[0].mxu0 %v39_v30  ;;  %1455 = vmatmul.mubr.f32.vlgmr.msra.gmra.mrb[0].mxu1 %v40_v31 }
  0x25   :  { %1793 = vmatpush3.bf16.msra.mxu0 %v2077_v3  ;;  %1825 = vmatpush3.bf16.msra.mxu1 %v2077_v3 }
  0x26   :  { %1419 = vmatprep.mubr.f32.mxu0 %v48_v32  ;;  %1795 = vmatprep.subr.bf16.mxu0 %v2082_v5 }
  0x27   :  { %1827 = vmatprep.subr.bf16.mxu1 %v2082_v5  ;;  %1457 = vmatprep.mubr.f32.mxu1 %v49_v33 }
  0x28   :  { %1420 = vmatmul.mubr.f32.gmra.mrb[2].mxu0 %v57_v34  ;;  %1458 = vmatmul.mubr.f32.gmra.mrb[2].mxu1 %v58_v35 }
  0x29   :  { %1797 = vmatpush3.bf16.msra.mxu0 %v2082_v5  ;;  %1829 = vmatpush3.bf16.msra.mxu1 %v2082_v5 }
  0x2a   :  { %1799 = vmatprep.subr.bf16.mxu0 %v2096_v8  ;;  %1831 = vmatprep.subr.bf16.mxu1 %v2096_v8 }
  0x2b   :  { %1492 = vmatprep.mubr.f32.mxu0 %v32_v36  ;;  %1530 = vmatprep.mubr.f32.mxu1 %v33_v37  ;;  %v1203_v37 = vld [vmem:[%s2513_s2 + $0x8] ss:$0 sm:$0xff] }
  0x2d   :  { %1801 = vmatpush3.bf16.msra.mxu0 %v2096_v8  ;;  %1833 = vmatpush3.bf16.msra.mxu1 %v2096_v8 }
  0x2e   :  { %1803 = vmatprep.subr.bf16.mxu0 %v2114_v13  ;;  %1835 = vmatprep.subr.bf16.mxu1 %v2114_v13 }
  0x31   :  { %1805 = vmatpush3.bf16.msra.mxu0 %v2114_v13  ;;  %1837 = vmatpush3.bf16.msra.mxu1 %v2114_v13 }
  0x32   :  { %1807 = vmatprep.subr.bf16.mxu0 %v2126_v16  ;;  %1839 = vmatprep.subr.bf16.mxu1 %v2126_v16 }
  0x35   :  { %1809 = vmatpush3.bf16.msra.mxu0 %v2126_v16  ;;  %1841 = vmatpush3.bf16.msra.mxu1 %v2126_v16 }
  0x36   :  { %1811 = vmatprep.subr.bf16.mxu0 %v2148_v22  ;;  %1843 = vmatprep.subr.bf16.mxu1 %v2148_v22 }
  0x39   :  { %1813 = vmatpush3.bf16.msra.mxu0 %v2148_v22  ;;  %1845 = vmatpush3.bf16.msra.mxu1 %v2148_v22 }
  0x3a   :  { %1815 = vmatprep.subr.bf16.mxu0 %v2165_v26  ;;  %1847 = vmatprep.subr.bf16.mxu1 %v2165_v26 }
  0x3d   :  { %1817 = vmatpush3.bf16.msra.mxu0 %v2165_v26  ;;  %1849 = vmatpush3.bf16.msra.mxu1 %v2165_v26 }
  0x3e   :  { %1819 = vmatprep.subr.bf16.mxu0 %v2178_v29  ;;  %1851 = vmatprep.subr.bf16.mxu1 %v2178_v29 }
  0x41   :  { %1821 = vmatpush3.bf16.msra.mxu0 %v2178_v29  ;;  %1853 = vmatpush3.bf16.msra.mxu1 %v2178_v29 }
  0x42   :  { %1855 = vmatprep.subr.bf16.mxu0 %v2077_v3  ;;  %1887 = vmatprep.subr.bf16.mxu1 %v2077_v3 }
  0x44   :  { %1493 = vmatmul.mubr.f32.vlgmr.msra.gmra.mrb[4].mxu0 %v41_v40  ;;  %1531 = vmatmul.mubr.f32.vlgmr.msra.gmra.mrb[4].mxu1 %v42_v41 }
  0x45   :  { %1857 = vmatpush3.bf16.msra.mxu0 %v2077_v3  ;;  %1889 = vmatpush3.bf16.msra.mxu1 %v2077_v3 }
  0x46   :  { %1495 = vmatprep.mubr.f32.mxu0 %v50_v42  ;;  %1859 = vmatprep.subr.bf16.mxu0 %v2082_v5 }
  0x47   :  { %1891 = vmatprep.subr.bf16.mxu1 %v2082_v5  ;;  %1533 = vmatprep.mubr.f32.mxu1 %v51_v43 }
  0x48   :  { %1496 = vmatmul.mubr.f32.gmra.mrb[6].mxu0 %v59_v44  ;;  %1534 = vmatmul.mubr.f32.gmra.mrb[6].mxu1 %v60_v45 }
  0x49   :  { %1861 = vmatpush3.bf16.msra.mxu0 %v2082_v5  ;;  %1893 = vmatpush3.bf16.msra.mxu1 %v2082_v5 }
  0x4a   :  { %1863 = vmatprep.subr.bf16.mxu0 %v2096_v8  ;;  %1895 = vmatprep.subr.bf16.mxu1 %v2096_v8 }
  0x4b   :  { %1606 = vmatprep.mubr.f32.mxu1 %v35_v46  ;;  %1568 = vmatprep.mubr.f32.mxu0 %v34_v47 }
  0x4d   :  { %1865 = vmatpush3.bf16.msra.mxu0 %v2096_v8  ;;  %1897 = vmatpush3.bf16.msra.mxu1 %v2096_v8 }
  0x4e   :  { %1867 = vmatprep.subr.bf16.mxu0 %v2114_v13  ;;  %1899 = vmatprep.subr.bf16.mxu1 %v2114_v13 }
  0x51   :  { %1869 = vmatpush3.bf16.msra.mxu0 %v2114_v13  ;;  %1901 = vmatpush3.bf16.msra.mxu1 %v2114_v13 }
  0x52   :  { %1871 = vmatprep.subr.bf16.mxu0 %v2126_v16  ;;  %1903 = vmatprep.subr.bf16.mxu1 %v2126_v16 }
  0x55   :  { %1873 = vmatpush3.bf16.msra.mxu0 %v2126_v16  ;;  %1905 = vmatpush3.bf16.msra.mxu1 %v2126_v16 }
  0x56   :  { %1875 = vmatprep.subr.bf16.mxu0 %v2148_v22  ;;  %1907 = vmatprep.subr.bf16.mxu1 %v2148_v22 }
  0x59   :  { %1877 = vmatpush3.bf16.msra.mxu0 %v2148_v22  ;;  %1909 = vmatpush3.bf16.msra.mxu1 %v2148_v22 }
  0x5a   :  { %1879 = vmatprep.subr.bf16.mxu0 %v2165_v26  ;;  %1911 = vmatprep.subr.bf16.mxu1 %v2165_v26 }
  0x5d   :  { %1881 = vmatpush3.bf16.msra.mxu0 %v2165_v26  ;;  %1913 = vmatpush3.bf16.msra.mxu1 %v2165_v26 }
  0x5e   :  { %1883 = vmatprep.subr.bf16.mxu0 %v2178_v29  ;;  %1915 = vmatprep.subr.bf16.mxu1 %v2178_v29 }
  0x61   :  { %1885 = vmatpush3.bf16.msra.mxu0 %v2178_v29  ;;  %1917 = vmatpush3.bf16.msra.mxu1 %v2178_v29 }
  0x62   :  { %1919 = vmatprep.subr.bf16.mxu0 %v2077_v3  ;;  %1951 = vmatprep.subr.bf16.mxu1 %v2077_v3 }
  0x64   :  { %1607 = vmatmul.mubr.f32.vlgmr.msra.gmra.mrb[8].mxu1 %v44_v48  ;;  %1569 = vmatmul.mubr.f32.vlgmr.msra.gmra.mrb[8].mxu0 %v43_v49 }
  0x65   :  { %1921 = vmatpush3.bf16.msra.mxu0 %v2077_v3  ;;  %1609 = vmatprep.mubr.f32.mxu1 %v53_v50 }
  0x66   :  { %1923 = vmatprep.subr.bf16.mxu0 %v2082_v5  ;;  %1571 = vmatprep.mubr.f32.mxu0 %v52_v51 }
  0x67   :  { %1953 = vmatpush3.bf16.msra.mxu1 %v2077_v3 }
  0x68   :  { %1610 = vmatmul.mubr.f32.gmra.mrb[10].mxu1 %v62_v52  ;;  %1572 = vmatmul.mubr.f32.gmra.mrb[10].mxu0 %v61_v53 }
  0x69   :  { %1925 = vmatpush3.bf16.msra.mxu0 %v2082_v5  ;;  %1644 = vmatprep.mubr.f32.mxu0 %v36_v54 }
  0x6a   :  { %1927 = vmatprep.subr.bf16.mxu0 %v2096_v8  ;;  %1955 = vmatprep.subr.bf16.mxu1 %v2082_v5 }
  0x6b   :  { %1957 = vmatpush3.bf16.msra.mxu1 %v2082_v5  ;;  %1682 = vmatprep.mubr.f32.mxu1 %v37_v55 }
  0x6c   :  { %1959 = vmatprep.subr.bf16.mxu1 %v2096_v8 }
  0x6d   :  { %1929 = vmatpush3.bf16.msra.mxu0 %v2096_v8 }
  0x6e   :  { %1931 = vmatprep.subr.bf16.mxu0 %v2114_v13 }
  0x6f   :  { %1961 = vmatpush3.bf16.msra.mxu1 %v2096_v8 }
  0x70   :  { %1963 = vmatprep.subr.bf16.mxu1 %v2114_v13 }
  0x71   :  { %1933 = vmatpush3.bf16.msra.mxu0 %v2114_v13 }
  0x72   :  { %1935 = vmatprep.subr.bf16.mxu0 %v2126_v16 }
  0x73   :  { %1965 = vmatpush3.bf16.msra.mxu1 %v2114_v13 }
  0x74   :  { %1967 = vmatprep.subr.bf16.mxu1 %v2126_v16 }
  0x75   :  { %1937 = vmatpush3.bf16.msra.mxu0 %v2126_v16 }
  0x76   :  { %1939 = vmatprep.subr.bf16.mxu0 %v2148_v22 }
  0x77   :  { %1969 = vmatpush3.bf16.msra.mxu1 %v2126_v16 }
  0x78   :  { %1971 = vmatprep.subr.bf16.mxu1 %v2148_v22 }
  0x79   :  { %1941 = vmatpush3.bf16.msra.mxu0 %v2148_v22 }
  0x7a   :  { %1943 = vmatprep.subr.bf16.mxu0 %v2165_v26 }
  0x7b   :  { %1973 = vmatpush3.bf16.msra.mxu1 %v2148_v22 }
  0x7c   :  { %1975 = vmatprep.subr.bf16.mxu1 %v2165_v26 }
  0x7d   :  { %1945 = vmatpush3.bf16.msra.mxu0 %v2165_v26 }
  0x7e   :  { %1947 = vmatprep.subr.bf16.mxu0 %v2178_v29 }
  0x7f   :  { %1977 = vmatpush3.bf16.msra.mxu1 %v2165_v26 }
  0x80   :  { %1979 = vmatprep.subr.bf16.mxu1 %v2178_v29 }
  0x81   :  { %1949 = vmatpush3.bf16.msra.mxu0 %v2178_v29 }
  0x82   :  { %1983 = vmatprep.subr.bf16.mxu0 %v2077_v3 }
  0x83   :  { %1981 = vmatpush3.bf16.msra.mxu1 %v2178_v29 }
  0x84   :  { %1645 = vmatmul.mubr.f32.vlgmr.msra.gmra.mrb[12].mxu0 %v45_v56  ;;  %2014 = vmatprep.subr.bf16.mxu1 %v2077_v3 }
  0x85   :  { %1647 = vmatprep.mubr.f32.mxu0 %v54_v57  ;;  %1985 = vmatpush3.bf16.msra.mxu0 %v2077_v3 }
  0x86   :  { %1683 = vmatmul.mubr.f32.vlgmr.msra.gmra.mrb[12].mxu1 %v46_v58  ;;  %1987 = vmatprep.subr.bf16.mxu0 %v2082_v5 }
  0x87   :  { %2022 = vmatpush3.bf16.msra.mxu1 %v2077_v3  ;;  %1685 = vmatprep.mubr.f32.mxu1 %v55_v59  ;;  %v163_v3 = vpop.permute.xlu0 %162 }
  0x88   :  { %1648 = vmatmul.mubr.f32.gmra.mrb[14].mxu0 %v63_v60  ;;  %2015 = vmatprep.subr.bf16.mxu1 %v2082_v5 }
  0x89   :  { %1989 = vmatpush3.bf16.msra.mxu0 %v2082_v5  ;;  %1720 = vmatprep.mubr.f32.mxu0 %v38_v61 }
  0x8a   :  { %1991 = vmatprep.subr.bf16.mxu0 %v2096_v8  ;;  %1686 = vmatmul.mubr.f32.gmra.mrb[14].mxu1 %v64_v62 }
  0x8b   :  { %2023 = vmatpush3.bf16.msra.mxu1 %v2082_v5  ;;  %1723 = vmatprep.mubr.f32.mxu1 %v56_v63  ;;  %v290_v10 = vpop.permute.xlu0 %289 }
  0x8c   :  { %2016 = vmatprep.subr.bf16.mxu1 %v2096_v8 }
  0x8d   :  { %1993 = vmatpush3.bf16.msra.mxu0 %v2096_v8 }
  0x8e   :  { %1995 = vmatprep.subr.bf16.mxu0 %v2114_v13 }
  0x8f   :  { %2024 = vmatpush3.bf16.msra.mxu1 %v2096_v8  ;;  %v768_v41 = vpop.permute.xlu0 %767 }
  0x90   :  { %2017 = vmatprep.subr.bf16.mxu1 %v2114_v13 }
  0x91   :  { %1997 = vmatpush3.bf16.msra.mxu0 %v2114_v13 }
  0x92   :  { %1999 = vmatprep.subr.bf16.mxu0 %v2126_v16 }
  0x93   :  { %2025 = vmatpush3.bf16.msra.mxu1 %v2114_v13 }
  0x94   :  { %2018 = vmatprep.subr.bf16.mxu1 %v2126_v16 }
  0x95   :  { %2001 = vmatpush3.bf16.msra.mxu0 %v2126_v16 }
  0x96   :  { %2003 = vmatprep.subr.bf16.mxu0 %v2148_v22 }
  0x97   :  { %2026 = vmatpush3.bf16.msra.mxu1 %v2126_v16 }
  0x98   :  { %2019 = vmatprep.subr.bf16.mxu1 %v2148_v22 }
  0x99   :  { %2005 = vmatpush3.bf16.msra.mxu0 %v2148_v22 }
  0x9a   :  { %2007 = vmatprep.subr.bf16.mxu0 %v2165_v26 }
  0x9b   :  { %2027 = vmatpush3.bf16.msra.mxu1 %v2148_v22  ;;  %v417_v22 = vpop.permute.xlu1 %416 }
  0x9c   :  { %2020 = vmatprep.subr.bf16.mxu1 %v2165_v26 }
  0x9d   :  { %2009 = vmatpush3.bf16.msra.mxu0 %v2165_v26 }
  0x9e   :  { %2011 = vmatprep.subr.bf16.mxu0 %v2178_v29 }
  0x9f   :  { %2028 = vmatpush3.bf16.msra.mxu1 %v2165_v26 }
  0xa0   :  { %2021 = vmatprep.subr.bf16.mxu1 %v2178_v29 }
  0xa1   :  { %2013 = vmatpush3.bf16.msra.mxu0 %v2178_v29 }
  0xa3   :  { %2029 = vmatpush3.bf16.msra.mxu1 %v2178_v29  ;;  %v544_v29 = vpop.permute.xlu1 %543 }
  0xa4   :  { %1721 = vmatmul.mubr.f32.vlgmr.msra.gmra.mrb[16].mxu0 %v47_v0 }
  0xa6   :  { %1724 = vmatmul.mubr.f32.vlgmr.msra.gmra.mrb[16].mxu1 %v65_v1 }
  0xa7   :  { %v895_v54 = vpop.permute.xlu1 %894 }
  0xf7   :  { %v1418_v4 = vpop.f32.mrb[0].mxu0  ;;  %v1456_v5 = vpop.f32.mrb[0].mxu1 }
  0xf8   :  { %v166_v6 = vmul.f32 %v1418_v4, %v163_v3  ;;  %v137_v7 = vpop.f32.mrb[1].mxu0  ;;  %v264_v8 = vpop.f32.mrb[1].mxu1  ;;  %v293_v18 = vmul.f32 %v1456_v5, %v290_v10  ;;  %v169_v4 = vld [vmem:[#allocation2] sm:$0xff] }
  0xf9   :  { %v165_v9 = vmul.f32 %v163_v3, %v137_v7  ;;  %v292_v17 = vmul.f32 %v290_v10, %v264_v8 }
  0xfa   :  { %179 = vrot.lane.b32.xlu0 %v166_v6, %s2046_s1 }
  0xfb   :  { %177 = vrot.lane.b32.xlu1 %v165_v9, %s2046_s1  ;;  %v1421_v11 = vpop.f32.mrb[2].mxu0  ;;  %v1459_v12 = vpop.f32.mrb[2].mxu1  ;;  %v172_v9 = vld [vmem:[#allocation2 + $0x18] sm:$0xff] }
  0xfc   :  { %v168_v13 = vmul.f32 %v1421_v11, %v163_v3  ;;  %v147_v14 = vpop.f32.mrb[3].mxu0  ;;  %v274_v15 = vpop.f32.mrb[3].mxu1  ;;  %v295_v20 = vmul.f32 %v1459_v12, %v290_v10 }
  0xfd   :  { %v167_v16 = vmul.f32 %v163_v3, %v147_v14  ;;  %v294_v19 = vmul.f32 %v290_v10, %v274_v15  ;;  %v170_v3 = vld [vmem:[#allocation2 + $0x8] sm:$0xff]  ;;  %v171_v10 = vld [vmem:[#allocation2 + $0x10] sm:$0xff] }
  0xfe   :  { %183 = vrot.lane.b32.xlu0 %v168_v13, %s2046_s1 }
  0xff   :  { %181 = vrot.lane.b32.xlu1 %v167_v16, %s2046_s1 }
 0x102   :  { %304 = vrot.lane.b32.xlu0 %v292_v17, %s2047_s11 }
 0x103   :  { %306 = vrot.lane.b32.xlu1 %v293_v18, %s2047_s11 }
 0x106   :  { %308 = vrot.lane.b32.xlu0 %v294_v19, %s2047_s11 }
 0x107   :  { %310 = vrot.lane.b32.xlu1 %v295_v20, %s2047_s11 }
 0x10a   :  { %1021 = vrot.lane.b32.xlu0 %v1202_v21, %s2047_s11 }
 0x117   :  { %v1494_v23 = vpop.f32.mrb[4].mxu0  ;;  %v1532_v24 = vpop.f32.mrb[4].mxu1 }
 0x118   :  { %v420_v25 = vmul.f32 %v1494_v23, %v417_v22  ;;  %v391_v26 = vpop.f32.mrb[5].mxu0  ;;  %v518_v27 = vpop.f32.mrb[5].mxu1  ;;  %v547_v39 = vmul.f32 %v1532_v24, %v544_v29 }
 0x119   :  { %v419_v28 = vmul.f32 %v417_v22, %v391_v26  ;;  %v546_v36 = vmul.f32 %v544_v29, %v518_v27 }
 0x11a   :  { %433 = vrot.lane.b32.xlu0 %v420_v25, %s2044_s29 }
 0x11b   :  { %v1497_v30 = vpop.f32.mrb[6].mxu0  ;;  %431 = vrot.lane.b32.xlu1 %v419_v28, %s2044_s29  ;;  %v1535_v31 = vpop.f32.mrb[6].mxu1 }
 0x11c   :  { %v422_v32 = vmul.f32 %v1497_v30, %v417_v22  ;;  %v401_v33 = vpop.f32.mrb[7].mxu0  ;;  %v528_v34 = vpop.f32.mrb[7].mxu1  ;;  %v549_v40 = vmul.f32 %v1535_v31, %v544_v29 }
 0x11d   :  { %v421_v35 = vmul.f32 %v417_v22, %v401_v33  ;;  %v548_v38 = vmul.f32 %v544_v29, %v528_v34 }
 0x11e   :  { %437 = vrot.lane.b32.xlu0 %v422_v32, %s2044_s29 }
 0x11f   :  { %435 = vrot.lane.b32.xlu1 %v421_v35, %s2044_s29 }
 0x122   :  { %558 = vrot.lane.b32.xlu0 %v546_v36, %s2043_s28 }
 0x123   :  { %1148 = vrot.lane.b32.xlu1 %v1203_v37, %s2046_s1 }
 0x126   :  { %562 = vrot.lane.b32.xlu0 %v548_v38, %s2043_s28 }
 0x127   :  { %560 = vrot.lane.b32.xlu1 %v547_v39, %s2043_s28 }
 0x12b   :  { %564 = vrot.lane.b32.xlu1 %v549_v40, %s2043_s28 }
 0x137   :  { %v1608_v42 = vpop.f32.mrb[8].mxu1  ;;  %v2447_v43 = vpop.f32.mrb[8].mxu0 }
 0x138   :  { %v742_v44 = vpop.f32.mrb[9].mxu1  ;;  %v771_v45 = vmul.f32 %v1608_v42, %v768_v41  ;;  %v2449_v46 = vpop.f32.mrb[9].mxu0 }
 0x139   :  { %v770_v47 = vmul.f32 %v768_v41, %v742_v44 }
 0x13a   :  { %784 = vrot.lane.b32.xlu1 %v771_v45, %s2042_s5 }
 0x13b   :  { %v1611_v48 = vpop.f32.mrb[10].mxu1  ;;  %782 = vrot.lane.b32.xlu0 %v770_v47, %s2042_s5  ;;  %v2453_v49 = vpop.f32.mrb[10].mxu0 }
 0x13c   :  { %v773_v50 = vmul.f32 %v1611_v48, %v768_v41  ;;  %v752_v51 = vpop.f32.mrb[11].mxu1  ;;  %v2455_v52 = vpop.f32.mrb[11].mxu0 }
 0x13d   :  { %v772_v53 = vmul.f32 %v768_v41, %v752_v51 }
 0x13e   :  { %788 = vrot.lane.b32.xlu1 %v773_v50, %s2042_s5 }
 0x13f   :  { %786 = vrot.lane.b32.xlu0 %v772_v53, %s2042_s5 }
 0x157   :  { %v1646_v55 = vpop.f32.mrb[12].mxu0 }
 0x158   :  { %v898_v56 = vmul.f32 %v1646_v55, %v895_v54  ;;  %v869_v57 = vpop.f32.mrb[13].mxu0 }
 0x159   :  { %v897_v58 = vmul.f32 %v895_v54, %v869_v57  ;;  %v1684_v59 = vpop.f32.mrb[12].mxu1 }
 0x15a   :  { %911 = vrot.lane.b32.xlu1 %v898_v56, %s2040_s24  ;;  %v996_v60 = vpop.f32.mrb[13].mxu1 }
 0x15b   :  { %909 = vrot.lane.b32.xlu0 %v897_v58, %s2040_s24  ;;  %v1649_v61 = vpop.f32.mrb[14].mxu0 }
 0x15c   :  { %v900_v62 = vmul.f32 %v1649_v61, %v895_v54  ;;  %v879_v63 = vpop.f32.mrb[15].mxu0 }
 0x15d   :  { %v899_v0 = vmul.f32 %v895_v54, %v879_v63  ;;  %v1687_v1 = vpop.f32.mrb[14].mxu1 }
 0x15e   :  { %915 = vrot.lane.b32.xlu1 %v900_v62, %s2040_s24  ;;  %v1006_v2 = vpop.f32.mrb[15].mxu1 }
 0x15f   :  { %913 = vrot.lane.b32.xlu0 %v899_v0, %s2040_s24 }
 0x16c   :  { %v180_v5 = vpop.permute.xlu0 %179 }
 0x16d   :  { %v190_v6 = vadd.f32 %v180_v5, %v170_v3  ;;  %v178_v7 = vpop.permute.xlu1 %177 }
 0x16e   :  { %v189_v8 = vadd.f32 %v178_v7, %v169_v4 }
 0x16f   :  { %195 = vst.msk [vmem:[#allocation2 + $0x8] sm:$0xff] %vm193_vm1, %v190_v6 }
 0x170   :  { %194 = vst.msk [vmem:[#allocation2] sm:$0xff] %vm193_vm1, %v189_v8  ;;  %v184_v11 = vpop.permute.xlu0 %183 }
 0x171   :  { %v192_v12 = vadd.f32 %v184_v11, %v172_v9  ;;  %v182_v13 = vpop.permute.xlu1 %181 }
 0x172   :  { %v191_v14 = vadd.f32 %v182_v13, %v171_v10 }
 0x173   :  { %197 = vst.msk [vmem:[#allocation2 + $0x18] sm:$0xff] %vm193_vm1, %v192_v12 }
 0x174   :  { %196 = vst.msk [vmem:[#allocation2 + $0x10] sm:$0xff] %vm193_vm1, %v191_v14  ;;  %v305_v15 = vpop.permute.xlu0 %304 }
 0x175   :  { %v307_v16 = vpop.permute.xlu1 %306 }
 0x176   :  { %v297_v17 = vld [vmem:[#allocation2 + $0x8] sm:$0xff] }
 0x177   :  { %v296_v18 = vld [vmem:[#allocation2] sm:$0xff]  ;;  %v317_v19 = vadd.f32 %v307_v16, %v297_v17  ;;  %v1722_v20 = vpop.f32.mrb[16].mxu0 }
 0x178   :  { %v316_v21 = vadd.f32 %v305_v15, %v296_v18  ;;  %v309_v22 = vpop.permute.xlu0 %308  ;;  %v1123_v23 = vpop.f32.mrb[17].mxu0 }
 0x179   :  { %322 = vst.msk [vmem:[#allocation2 + $0x8] sm:$0xff] %vm320_vm2, %v317_v19  ;;  %v311_v24 = vpop.permute.xlu1 %310  ;;  %v1725_v25 = vpop.f32.mrb[16].mxu1 }
 0x17a   :  { %321 = vst.msk [vmem:[#allocation2] sm:$0xff] %vm320_vm2, %v316_v21  ;;  %v299_v26 = vld [vmem:[#allocation2 + $0x18] sm:$0xff]  ;;  %v1133_v27 = vpop.f32.mrb[17].mxu1 }
 0x17b   :  { %v298_v28 = vld [vmem:[#allocation2 + $0x10] sm:$0xff]  ;;  %v319_v29 = vadd.f32 %v311_v24, %v299_v26 }
 0x17c   :  { %v318_v30 = vadd.f32 %v309_v22, %v298_v28  ;;  %v1022_v31 = vpop.permute.xlu0 %1021 }
 0x17d   :  { %v1024_v32 = vmul.f32 %v1022_v31, %v996_v60  ;;  %v1025_v33 = vmul.f32 %v1684_v59, %v1022_v31  ;;  %324 = vst.msk [vmem:[#allocation2 + $0x18] sm:$0xff] %vm320_vm2, %v319_v29  ;;  %v1027_v34 = vmul.f32 %v1687_v1, %v1022_v31  ;;  %v1026_v35 = vmul.f32 %v1022_v31, %v1006_v2 }
 0x17e   :  { %323 = vst.msk [vmem:[#allocation2 + $0x10] sm:$0xff] %vm320_vm2, %v318_v30 }
 0x17f   :  { %1036 = vrot.lane.b32.xlu0 %v1024_v32, %s2041_s25  ;;  %1038 = vrot.lane.b32.xlu1 %v1025_v33, %s2041_s25 }
 0x180   :  { %v424_v37 = vld [vmem:[#allocation2 + $0x8] sm:$0xff] }
 0x181   :  { %v423_v39 = vld [vmem:[#allocation2] sm:$0xff] }
 0x183   :  { %1040 = vrot.lane.b32.xlu0 %v1026_v35, %s2041_s25  ;;  %1042 = vrot.lane.b32.xlu1 %v1027_v34, %s2041_s25 }
 0x184   :  { %v426_v44 = vld [vmem:[#allocation2 + $0x18] sm:$0xff] }
 0x185   :  { %v425_v47 = vld [vmem:[#allocation2 + $0x10] sm:$0xff] }
 0x18c   :  { %v434_v36 = vpop.permute.xlu0 %433 }
 0x18d   :  { %v444_v38 = vadd.f32 %v434_v36, %v424_v37  ;;  %v432_v40 = vpop.permute.xlu1 %431 }
 0x18e   :  { %v443_v41 = vadd.f32 %v432_v40, %v423_v39 }
 0x18f   :  { %449 = vst.msk [vmem:[#allocation2 + $0x8] sm:$0xff] %vm447_vm3, %v444_v38 }
 0x190   :  { %448 = vst.msk [vmem:[#allocation2] sm:$0xff] %vm447_vm3, %v443_v41  ;;  %v438_v42 = vpop.permute.xlu0 %437 }
 0x191   :  { %v446_v45 = vadd.f32 %v438_v42, %v426_v44  ;;  %v436_v48 = vpop.permute.xlu1 %435 }
 0x192   :  { %v445_v50 = vadd.f32 %v436_v48, %v425_v47 }
 0x193   :  { %451 = vst.msk [vmem:[#allocation2 + $0x18] sm:$0xff] %vm447_vm3, %v446_v45 }
 0x194   :  { %450 = vst.msk [vmem:[#allocation2 + $0x10] sm:$0xff] %vm447_vm3, %v445_v50  ;;  %v559_v51 = vpop.permute.xlu0 %558 }
 0x195   :  { %v1149_v53 = vpop.permute.xlu1 %1148 }
 0x196   :  { %v1152_v54 = vmul.f32 %v1722_v20, %v1149_v53  ;;  %v1151_v55 = vmul.f32 %v1149_v53, %v1123_v23  ;;  %v551_v58 = vld [vmem:[#allocation2 + $0x8] sm:$0xff]  ;;  %v1154_v62 = vmul.f32 %v1725_v25, %v1149_v53  ;;  %v1153_v63 = vmul.f32 %v1149_v53, %v1133_v27 }
 0x197   :  { %v550_v56 = vld [vmem:[#allocation2] sm:$0xff] }
 0x198   :  { %v570_v57 = vadd.f32 %v559_v51, %v550_v56  ;;  %1165 = vrot.lane.b32.xlu1 %v1152_v54, %s2039_s15  ;;  %1163 = vrot.lane.b32.xlu0 %v1151_v55, %s2039_s15  ;;  %v563_v60 = vpop.permute.xlu0 %562 }
 0x199   :  { %v561_v59 = vpop.permute.xlu1 %560 }
 0x19a   :  { %575 = vst.msk [vmem:[#allocation2] sm:$0xff] %vm574_vm4, %v570_v57  ;;  %v571_v61 = vadd.f32 %v561_v59, %v551_v58  ;;  %v553_v2 = vld [vmem:[#allocation2 + $0x18] sm:$0xff] }
 0x19b   :  { %v552_v0 = vld [vmem:[#allocation2 + $0x10] sm:$0xff] }
 0x19c   :  { %576 = vst.msk [vmem:[#allocation2 + $0x8] sm:$0xff] %vm574_vm4, %v571_v61  ;;  %v572_v1 = vadd.f32 %v563_v60, %v552_v0  ;;  %1169 = vrot.lane.b32.xlu1 %v1154_v62, %s2039_s15  ;;  %1167 = vrot.lane.b32.xlu0 %v1153_v63, %s2039_s15 }
 0x19d   :  { %v565_v3 = vpop.permute.xlu1 %564 }
 0x19e   :  { %577 = vst.msk [vmem:[#allocation2 + $0x10] sm:$0xff] %vm574_vm4, %v572_v1  ;;  %v573_v4 = vadd.f32 %v565_v3, %v553_v2 }
 0x1a0   :  { %578 = vst.msk [vmem:[#allocation2 + $0x18] sm:$0xff] %vm574_vm4, %v573_v4 }
 0x1a1   :  { %v664_v5 = vld [vmem:[#allocation2] sm:$0xff] }
 0x1a2   :  { %v668_v6 = vadd.f32 %v664_v5, %v2449_v46 }
 0x1a3   :  { %v665_v7 = vld [vmem:[#allocation2 + $0x8] sm:$0xff] }
 0x1a4   :  { %672 = vst.msk [vmem:[#allocation2] sm:$0xff] %vm66_vm0, %v668_v6  ;;  %v669_v8 = vadd.f32 %v2447_v43, %v665_v7 }
 0x1a5   :  { %v666_v9 = vld [vmem:[#allocation2 + $0x10] sm:$0xff] }
 0x1a6   :  { %673 = vst.msk [vmem:[#allocation2 + $0x8] sm:$0xff] %vm66_vm0, %v669_v8  ;;  %v670_v10 = vadd.f32 %v666_v9, %v2455_v52 }
 0x1a7   :  { %v667_v11 = vld [vmem:[#allocation2 + $0x18] sm:$0xff] }
 0x1a8   :  { %674 = vst.msk [vmem:[#allocation2 + $0x10] sm:$0xff] %vm66_vm0, %v670_v10  ;;  %v671_v12 = vadd.f32 %v2453_v49, %v667_v11 }
 0x1aa   :  { %675 = vst.msk [vmem:[#allocation2 + $0x18] sm:$0xff] %vm66_vm0, %v671_v12 }
 0x1ab   :  { %v774_v14 = vld [vmem:[#allocation2] sm:$0xff] }
 0x1ac   :  { %v785_v13 = vpop.permute.xlu1 %784 }
 0x1ad   :  { %v783_v46 = vpop.permute.xlu0 %782  ;;  %v775_v15 = vld [vmem:[#allocation2 + $0x8] sm:$0xff] }
 0x1ae   :  { %v794_v16 = vadd.f32 %v783_v46, %v774_v14  ;;  %v795_v17 = vadd.f32 %v785_v13, %v775_v15 }
 0x1af   :  { %v776_v19 = vld [vmem:[#allocation2 + $0x10] sm:$0xff] }
 0x1b0   :  { %799 = vst.msk [vmem:[#allocation2] sm:$0xff] %vm798_vm5, %v794_v16  ;;  %800 = vst.msk [vmem:[#allocation2 + $0x8] sm:$0xff] %vm798_vm5, %v795_v17  ;;  %v789_v43 = vpop.permute.xlu1 %788 }
 0x1b1   :  { %v787_v18 = vpop.permute.xlu0 %786  ;;  %v777_v52 = vld [vmem:[#allocation2 + $0x18] sm:$0xff] }
 0x1b2   :  { %v796_v20 = vadd.f32 %v787_v18, %v776_v19  ;;  %v797_v21 = vadd.f32 %v789_v43, %v777_v52 }
 0x1b4   :  { %801 = vst.msk [vmem:[#allocation2 + $0x10] sm:$0xff] %vm798_vm5, %v796_v20  ;;  %802 = vst.msk [vmem:[#allocation2 + $0x18] sm:$0xff] %vm798_vm5, %v797_v21 }
 0x1b7   :  { %v902_v49 = vld [vmem:[#allocation2 + $0x8] sm:$0xff]  ;;  %v901_v25 = vld [vmem:[#allocation2] sm:$0xff] }
 0x1bb   :  { %v904_v27 = vld [vmem:[#allocation2 + $0x18] sm:$0xff]  ;;  %v903_v31 = vld [vmem:[#allocation2 + $0x10] sm:$0xff] }
 0x1cc   :  { %v912_v22 = vpop.permute.xlu1 %911 }
 0x1cd   :  { %v922_v23 = vadd.f32 %v912_v22, %v902_v49  ;;  %v910_v24 = vpop.permute.xlu0 %909 }
 0x1ce   :  { %v921_v26 = vadd.f32 %v910_v24, %v901_v25 }
 0x1cf   :  { %927 = vst.msk [vmem:[#allocation2 + $0x8] sm:$0xff] %vm925_vm6, %v922_v23 }
 0x1d0   :  { %926 = vst.msk [vmem:[#allocation2] sm:$0xff] %vm925_vm6, %v921_v26  ;;  %v916_v28 = vpop.permute.xlu1 %915 }
 0x1d1   :  { %v924_v29 = vadd.f32 %v916_v28, %v904_v27  ;;  %v914_v30 = vpop.permute.xlu0 %913 }
 0x1d2   :  { %v923_v32 = vadd.f32 %v914_v30, %v903_v31 }
 0x1d3   :  { %929 = vst.msk [vmem:[#allocation2 + $0x18] sm:$0xff] %vm925_vm6, %v924_v29 }
 0x1d4   :  { %928 = vst.msk [vmem:[#allocation2 + $0x10] sm:$0xff] %vm925_vm6, %v923_v32 }
 0x1d6   :  { %v1029_v35 = vld [vmem:[#allocation2 + $0x8] sm:$0xff] }
 0x1d7   :  { %v1028_v34 = vld [vmem:[#allocation2] sm:$0xff] }
 0x1da   :  { %v1031_v41 = vld [vmem:[#allocation2 + $0x18] sm:$0xff] }
 0x1db   :  { %v1030_v40 = vld [vmem:[#allocation2 + $0x10] sm:$0xff] }
 0x1f1   :  { %v1037_v33 = vpop.permute.xlu0 %1036  ;;  %v1039_v36 = vpop.permute.xlu1 %1038 }
 0x1f2   :  { %v1048_v37 = vadd.f32 %v1037_v33, %v1028_v34  ;;  %v1049_v38 = vadd.f32 %v1039_v36, %v1029_v35 }
 0x1f4   :  { %1053 = vst.msk [vmem:[#allocation2] sm:$0xff] %vm1052_vm7, %v1048_v37  ;;  %1054 = vst.msk [vmem:[#allocation2 + $0x8] sm:$0xff] %vm1052_vm7, %v1049_v38 }
 0x1f5   :  { %v1041_v39 = vpop.permute.xlu0 %1040  ;;  %v1043_v42 = vpop.permute.xlu1 %1042 }
 0x1f6   :  { %v1050_v44 = vadd.f32 %v1041_v39, %v1030_v40  ;;  %v1051_v45 = vadd.f32 %v1043_v42, %v1031_v41 }
 0x1f8   :  { %1055 = vst.msk [vmem:[#allocation2 + $0x10] sm:$0xff] %vm1052_vm7, %v1050_v44  ;;  %1056 = vst.msk [vmem:[#allocation2 + $0x18] sm:$0xff] %vm1052_vm7, %v1051_v45 }
 0x1fb   :  { %v1155_v47 = vld [vmem:[#allocation2] sm:$0xff]  ;;  %v1156_v50 = vld [vmem:[#allocation2 + $0x8] sm:$0xff] }
 0x1ff   :  { %v1157_v55 = vld [vmem:[#allocation2 + $0x10] sm:$0xff]  ;;  %v1158_v57 = vld [vmem:[#allocation2 + $0x18] sm:$0xff] }
 0x20a   :  { %v1164_v48 = vpop.permute.xlu0 %1163  ;;  %v1166_v51 = vpop.permute.xlu1 %1165 }
 0x20b   :  { %v1175_v53 = vadd.f32 %v1164_v48, %v1155_v47  ;;  %v1176_v54 = vadd.f32 %v1166_v51, %v1156_v50 }
 0x20d   :  { %1180 = vst.msk [vmem:[#allocation2] sm:$0xff] %vm1179_vm8, %v1175_v53  ;;  %1181 = vst.msk [vmem:[#allocation2 + $0x8] sm:$0xff] %vm1179_vm8, %v1176_v54 }
 0x20e   :  { %v1168_v56 = vpop.permute.xlu0 %1167  ;;  %v1170_v58 = vpop.permute.xlu1 %1169 }
 0x20f   :  { %v1177_v59 = vadd.f32 %v1168_v56, %v1157_v55  ;;  %v1178_v60 = vadd.f32 %v1170_v58, %v1158_v57 }
 0x211   :  { %1182 = vst.msk [vmem:[#allocation2 + $0x10] sm:$0xff] %vm1179_vm8, %v1177_v59  ;;  %1183 = vst.msk [vmem:[#allocation2 + $0x18] sm:$0xff] %vm1179_vm8, %v1178_v60 }
 0x214   :  { %v1184_v61 = vld [vmem:[#allocation2] sm:$0xff]  ;;  %v1185_v62 = vld [vmem:[#allocation2 + $0x8] sm:$0xff] }
 0x215   :  { %1188 = vst.msk [vmem:[%s2514_s3] sm:$0xff] %vm66_vm0, %v1184_v61  ;;  %1189 = vst.msk [vmem:[%s2514_s3 + $0x8] sm:$0xff] %vm66_vm0, %v1185_v62 }
 0x218   :  { %v1186_v63 = vld [vmem:[#allocation2 + $0x10] sm:$0xff]  ;;  %v1187_v0 = vld [vmem:[#allocation2 + $0x18] sm:$0xff] }
 0x219   :  { %1190 = vst.msk [vmem:[%s2514_s3 + $0x10] sm:$0xff] %vm66_vm0, %v1186_v63  ;;  %1191 = vst.msk [vmem:[%s2514_s3 + $0x18] sm:$0xff] %vm66_vm0, %v1187_v0 }

</bundles_post_ra>
